<compile_context>
chip_gen: v5e
topology: v5e:2x2
jax: 0.10.0
libtpu: 0.0.40
codegen_flags: <defaults>
</compile_context>

<pallas_src>
import functools

import jax
import jax.numpy as jnp
from jax import lax
from jax.experimental import pallas as pl
from jax.experimental.pallas import tpu as pltpu


_CHUNK_BYTES = 512 * 1024   # target f32 footprint of one in-kernel compute chunk


def _cdiv(a, b):
    return -(-a // b)


def _rup(a, m):
    return _cdiv(a, m) * m


def _hw_params():
    """Per-generation tile / VMEM budget (trace-time query, safe fallback)."""
    vmem_phys = 128 * 1024 * 1024
    try:
        info = pltpu.get_tpu_info()
        vmem_phys = int(getattr(info, "vmem_capacity_bytes", vmem_phys))
    except Exception:
        pass
    if vmem_phys <= 64 * 1024 * 1024:
        # v7x-class: 64 MiB VMEM per TensorCore, 2 TensorCores per chip.
        return {"tile_bytes": 2 * 1024 * 1024,
                "vmem_limit": 48 * 1024 * 1024,
                "min_grid_steps": 2}
    # v5e / v6e: 128 MiB VMEM, single TensorCore.
    return {"tile_bytes": 4 * 1024 * 1024,
            "vmem_limit": 80 * 1024 * 1024,
            "min_grid_steps": 1}


def _plan_packed(bc, hw, tile_bytes, min_grid_steps):
    """Tiling plan for the lane-packed kernel, or None if images are too big."""
    img_bytes = hw * 4                                    # f32 compute footprint
    cap8 = (tile_bytes // img_bytes) // 8 * 8             # images/tile, mult of 8
    if cap8 == 0:
        return None
    if bc < 8:
        tb = bc                                           # full-dim block (legal)
    else:
        nsteps = max(min_grid_steps, _cdiv(bc, cap8))
        tb = min(_rup(_cdiv(bc, nsteps), 8), (bc // 8) * 8, cap8)
    grid = _cdiv(bc, tb)
    # In-kernel chunking of the sublane axis bounds live temporaries / vregs.
    if tb % 8 != 0:
        chunk = tb
    else:
        chunk = min(tb, max(8, (_CHUNK_BYTES // img_bytes) // 8 * 8))
        while tb % chunk:
            chunk -= 8
    return {"tb": tb, "chunk": chunk, "grid": grid}


def _morph_packed_kernel(h, w, chunk, nchunks, col_ref, x_ref, dil_ref, ero_ref):
    """3x3 erosion/dilation on images flattened row-major along the lane axis.

    col_ref: (1, hw)  i32  column index of every flattened position
    x_ref:   (tb, hw) any  tb images per grid step, native input dtype
    dil/ero: (tb, hw) f32
    """
    hw = h * w
    col = col_ref[...]
    pos = lax.broadcasted_iota(jnp.int32, (1, hw), 1)
    left = col == 0
    right = col == w - 1
    top = pos < w
    bot = pos >= (h - 1) * w
    pinf = jnp.float32(jnp.inf)
    ninf = jnp.float32(-jnp.inf)

    # With w % 128 == 0 the +-w lane shifts are whole-vreg moves, so run the
    # horizontal (+-1) pass first: 2 expensive lane rotations instead of 4.
    if w % 128 == 0:
        passes = ((1 % hw, left, right), (w % hw, top, bot))
    else:
        passes = ((w % hw, top, bot), (1 % hw, left, right))
    (sh_a, lo_a, hi_a), (sh_b, lo_b, hi_b) = passes

    def process(x):
        x = x.astype(jnp.float32)                         # cast in-kernel
        a = pltpu.roll(x, sh_a, axis=1)                   # a[:, p] = x[:, p - sh_a]
        b = pltpu.roll(x, (hw - sh_a) % hw, axis=1)       # b[:, p] = x[:, p + sh_a]
        amin = jnp.minimum(x, jnp.minimum(jnp.where(lo_a, pinf, a),
                                          jnp.where(hi_a, pinf, b)))
        amax = jnp.maximum(x, jnp.maximum(jnp.where(lo_a, ninf, a),
                                          jnp.where(hi_a, ninf, b)))
        c = pltpu.roll(amin, sh_b, axis=1)
        d = pltpu.roll(amin, (hw - sh_b) % hw, axis=1)
        ero = jnp.minimum(amin, jnp.minimum(jnp.where(lo_b, pinf, c),
                                            jnp.where(hi_b, pinf, d)))
        e = pltpu.roll(amax, sh_b, axis=1)
        f = pltpu.roll(amax, (hw - sh_b) % hw, axis=1)
        dil = jnp.maximum(amax, jnp.maximum(jnp.where(lo_b, ninf, e),
                                            jnp.where(hi_b, ninf, f)))
        return dil, ero

    if nchunks <= 1:
        dil, ero = process(x_ref[...])
        dil_ref[...] = dil
        ero_ref[...] = ero
    else:
        def body(ci, carry):
            s = pl.multiple_of(ci * chunk, chunk)
            dil, ero = process(x_ref[pl.ds(s, chunk), :])
            dil_ref[pl.ds(s, chunk), :] = dil
            ero_ref[pl.ds(s, chunk), :] = ero
            return carry
        lax.fori_loop(0, nchunks, body, 0, unroll=True)


def _run_packed(xf, h, w, plan, vmem_limit):
    """xf: (bc, h, w), native dtype.  Lane-packed kernel.  Returns (dil, ero) f32."""
    bc = xf.shape[0]
    hw = h * w
    tb, chunk, grid = plan["tb"], plan["chunk"], plan["grid"]
    nchunks = tb // chunk
    x2 = xf.reshape(bc, hw)                               # contiguous: free reshape
    col = jnp.tile(jnp.arange(w, dtype=jnp.int32), h).reshape(1, hw)
    kernel = functools.partial(_morph_packed_kernel, h, w, chunk, nchunks)
    in_bytes = bc * hw * x2.dtype.itemsize
    dil, ero = pl.pallas_call(
        kernel,
        out_shape=(jax.ShapeDtypeStruct((bc, hw), jnp.float32),
                   jax.ShapeDtypeStruct((bc, hw), jnp.float32)),
        grid=(grid,),
        in_specs=[
            pl.BlockSpec((1, hw), lambda i: (0, 0)),      # same block every step
            pl.BlockSpec((tb, hw), lambda i: (i, 0)),     # ragged last block is fine
        ],
        out_specs=(
            pl.BlockSpec((tb, hw), lambda i: (i, 0)),
            pl.BlockSpec((tb, hw), lambda i: (i, 0)),
        ),
        compiler_params=pltpu.CompilerParams(
            dimension_semantics=("parallel",),
            vmem_limit_bytes=vmem_limit),
        cost_estimate=pl.CostEstimate(
            flops=16 * bc * hw, transcendentals=0,
            bytes_accessed=in_bytes + 8 * bc * hw),
    )(col, x2)
    return dil.reshape(bc, h, w), ero.reshape(bc, h, w)


def _morph_rowtile_kernel(h, w, th, x_ref, up_ref, dn_ref, dil_ref, ero_ref):
    """Row-tiled 3x3 erosion/dilation for large images.

    x_ref:  (1, th, w)  center row tile (native dtype)
    up_ref: (1, 8,  w)  8-row block whose sublane 7 is the row above the tile
    dn_ref: (1, 8,  w)  8-row block whose sublane 0 is the row below the tile
    """
    r = pl.program_id(1)
    pinf = jnp.float32(jnp.inf)
    ninf = jnp.float32(-jnp.inf)

    def hpass(v):
        # 3-tap horizontal (lane) min/max with in-bounds masking.
        cols = lax.broadcasted_iota(jnp.int32, v.shape, 1)
        lm = cols == 0
        rm = cols == w - 1
        a = pltpu.roll(v, 1 % w, axis=1)                  # a[:, j] = v[:, j-1]
        b = pltpu.roll(v, (w - 1) % w, axis=1)            # b[:, j] = v[:, j+1]
        vmin = jnp.minimum(v, jnp.minimum(jnp.where(lm, pinf, a),
                                          jnp.where(rm, pinf, b)))
        vmax = jnp.maximum(v, jnp.maximum(jnp.where(lm, ninf, a),
                                          jnp.where(rm, ninf, b)))
        return vmin, vmax

    hmin, hmax = hpass(x_ref[0].astype(jnp.float32))               # (th, w)
    u_rows = up_ref[0].astype(jnp.float32)                         # (8, w)
    d_rows = dn_ref[0].astype(jnp.float32)                         # (8, w)
    umin, umax = hpass(u_rows[7:8, :])                             # row above tile
    dmin, dmax = hpass(d_rows[0:1, :])                             # row below tile

    trow = lax.broadcasted_iota(jnp.int32, (th, w), 0)
    grow = trow + r * th
    first = trow == 0
    last = trow == th - 1
    top = grow == 0
    bot = grow == h - 1

    # Vertical (sublane) pass: in-tile rolls, halo substitution at the seams,
    # +-inf masking at the true image borders (also kills ragged-tail garbage).
    up_min = jnp.where(first, umin, pltpu.roll(hmin, 1 % th, axis=0))
    dn_min = jnp.where(last, dmin, pltpu.roll(hmin, (th - 1) % th, axis=0))
    ero_ref[0] = jnp.minimum(hmin, jnp.minimum(jnp.where(top, pinf, up_min),
                                               jnp.where(bot, pinf, dn_min)))
    up_max = jnp.where(first, umax, pltpu.roll(hmax, 1 % th, axis=0))
    dn_max = jnp.where(last, dmax, pltpu.roll(hmax, (th - 1) % th, axis=0))
    dil_ref[0] = jnp.maximum(hmax, jnp.maximum(jnp.where(top, ninf, up_max),
                                               jnp.where(bot, ninf, dn_max)))


def _run_rowtiled(xf, tile_bytes, vmem_limit):
    """xf: (bc, h, w) with h >= 8, native dtype.  Row-tiled large-image path."""
    bc, h, w = xf.shape
    th = min(h, max(8, (tile_bytes // (w * 4)) // 8 * 8))
    # If tiling rows (th < h), th is a multiple of 8 so the 1-row halos sit at
    # fixed sublanes of the (8, w) halo blocks.  th == h (single tile) is legal
    # too: the halos are then fully masked by the border masks.
    nrt = _cdiv(h, th)
    tb8 = th // 8
    nb8 = _cdiv(h, 8)
    kernel = functools.partial(_morph_rowtile_kernel, h, w, th)
    in_bytes = bc * h * w * xf.dtype.itemsize
    dil, ero = pl.pallas_call(
        kernel,
        out_shape=(jax.ShapeDtypeStruct((bc, h, w), jnp.float32),
                   jax.ShapeDtypeStruct((bc, h, w), jnp.float32)),
        grid=(bc, nrt),
        in_specs=[
            pl.BlockSpec((1, th, w), lambda bi, ri: (bi, ri, 0)),
            pl.BlockSpec((1, 8, w),
                         lambda bi, ri: (bi, jnp.maximum(ri * tb8 - 1, 0), 0)),
            pl.BlockSpec((1, 8, w),
                         lambda bi, ri: (bi, jnp.minimum((ri + 1) * tb8, nb8 - 1), 0)),
        ],
        out_specs=(
            pl.BlockSpec((1, th, w), lambda bi, ri: (bi, ri, 0)),
            pl.BlockSpec((1, th, w), lambda bi, ri: (bi, ri, 0)),
        ),
        compiler_params=pltpu.CompilerParams(
            dimension_semantics=("parallel", "parallel"),
            vmem_limit_bytes=vmem_limit),
        cost_estimate=pl.CostEstimate(
            flops=16 * bc * h * w, transcendentals=0,
            bytes_accessed=in_bytes + 8 * bc * h * w),
    )(xf, xf, xf)
    return dil, ero


def erosion_and_dilation(x):
    """x: (B, C, H, W), any float dtype.  Returns (dilated, eroded), float32."""
    b, c, h, w = x.shape
    bc = b * c
    hw = h * w
    xf = x.reshape(bc, h, w)                    # native dtype; cast happens in-kernel
    hp = _hw_params()
    plan = _plan_packed(bc, hw, hp["tile_bytes"], hp["min_grid_steps"])
    if plan is None and h < 8:
        # TODO(synk): degenerate very-wide images (h < 8 with enormous w) would
        # need lane tiling; pack anyway with an enlarged per-step budget.
        plan = _plan_packed(bc, hw, 8 * hw * 4, 1)
    if plan is not None:
        dil, ero = _run_packed(xf, h, w, plan, hp["vmem_limit"])
    else:
        dil, ero = _run_rowtiled(xf, hp["tile_bytes"], hp["vmem_limit"])
    return dil.reshape(b, c, h, w), ero.reshape(b, c, h, w)


def _reference(x):
    """Pure-JAX reference via reduce_window (min/max over the valid 3x3 window)."""
    xf = x.astype(jnp.float32)
    ero = lax.reduce_window(
        xf, jnp.inf, lax.min, (1, 1, 3, 3), (1, 1, 1, 1),
        ((0, 0), (0, 0), (1, 1), (1, 1)))
    dil = lax.reduce_window(
        xf, -jnp.inf, lax.max, (1, 1, 3, 3), (1, 1, 1, 1),
        ((0, 0), (0, 0), (1, 1), (1, 1)))
    return dil, ero


if __name__ == "__main__":
    key = jax.random.PRNGKey(0)
    k1, k2, k3 = jax.random.split(key, 3)

    # 1) Main path at the module's typical small feature-map size.
    x = jax.random.normal(k1, (2, 4, 16, 16), dtype=jnp.float32)
    dil, ero = erosion_and_dilation(x)
    jax.block_until_ready((dil, ero))
    dref, eref = _reference(x)
    assert dil.shape == x.shape and ero.shape == x.shape
    assert dil.dtype == jnp.float32 and ero.dtype == jnp.float32
    assert jnp.allclose(dil, dref), "dilation mismatch (packed)"
    assert jnp.allclose(ero, eref), "erosion mismatch (packed)"

    # 2) Packed path exercising the in-kernel sublane chunk loop + horiz-first rolls.
    x2 = jax.random.normal(k2, (2, 8, 128, 128), dtype=jnp.float32)
    dil2, ero2 = erosion_and_dilation(x2)
    jax.block_until_ready((dil2, ero2))
    dref2, eref2 = _reference(x2)
    assert jnp.allclose(dil2, dref2), "dilation mismatch (packed/chunked)"
    assert jnp.allclose(ero2, eref2), "erosion mismatch (packed/chunked)"

    # 3) bf16 input: DMA stays 16-bit, cast/compute in f32 inside the kernel.
    xb = x.astype(jnp.bfloat16)
    dil3, ero3 = erosion_and_dilation(xb)
    jax.block_until_ready((dil3, ero3))
    dref3, eref3 = _reference(xb.astype(jnp.float32))
    assert dil3.dtype == jnp.float32 and ero3.dtype == jnp.float32
    assert jnp.allclose(dil3, dref3), "dilation mismatch (bf16)"
    assert jnp.allclose(ero3, eref3), "erosion mismatch (bf16)"

    # 4) Row-tiled large-image path, forced small tiles incl. a ragged last tile.
    x4 = jax.random.normal(k3, (1, 3, 20, 128), dtype=jnp.float32)
    xr = x4.reshape(3, 20, 128)
    dil4, ero4 = _run_rowtiled(xr, 8 * 128 * 4, 32 * 1024 * 1024)
    jax.block_until_ready((dil4, ero4))
    dref4, eref4 = _reference(x4)
    assert jnp.allclose(dil4.reshape(x4.shape), dref4), "dilation mismatch (row-tiled)"
    assert jnp.allclose(ero4.reshape(x4.shape), eref4), "erosion mismatch (row-tiled)"

    print("KERNEL_OK")
</pallas_src>

<mosaic_0001>
module attributes {stable_mosaic.version = 11 : i64} {
  func.func @_morph_packed_kernel(%arg0: i32, %arg1: memref<1x256xi32, #tpu.memory_space<vmem>>, %arg2: memref<8x256xf32, #tpu.memory_space<vmem>>, %arg3: memref<8x256xf32, #tpu.memory_space<vmem>>, %arg4: memref<8x256xf32, #tpu.memory_space<vmem>>) attributes {dimension_semantics = [#tpu.dimension_semantics<parallel>], iteration_bounds = array<i64: 1>, scalar_prefetch = 0 : i64, scratch_operands = 0 : i64, tpu.core_type = #tpu.core_type<tc>, window_params = [{pipeline_mode = #tpu.pipeline_mode<synchronous>, transform_indices = @transform_0, window_bounds = array<i64: 1, 256>}, {transform_indices = @transform_1, window_bounds = array<i64: 8, 256>}, {transform_indices = @transform_2, window_bounds = array<i64: 8, 256>}, {transform_indices = @transform_3, window_bounds = array<i64: 8, 256>}]} {
    %c0 = arith.constant 0 : index
    %c0_0 = arith.constant 0 : index
    %0 = vector.load %arg1[%c0, %c0_0] : memref<1x256xi32, #tpu.memory_space<vmem>>, vector<1x256xi32>
    %1 = tpu.iota {dimensions = array<i32: 1>} : vector<1x256xi32>
    %c0_i32 = arith.constant 0 : i32
    %2 = vector.broadcast %c0_i32 : i32 to vector<1x256xi32>
    %3 = arith.cmpi eq, %0, %2 : vector<1x256xi32>
    %c15_i32 = arith.constant 15 : i32
    %4 = vector.broadcast %c15_i32 : i32 to vector<1x256xi32>
    %5 = arith.cmpi eq, %0, %4 : vector<1x256xi32>
    %c16_i32 = arith.constant 16 : i32
    %6 = vector.broadcast %c16_i32 : i32 to vector<1x256xi32>
    %7 = arith.cmpi slt, %1, %6 : vector<1x256xi32>
    %c240_i32 = arith.constant 240 : i32
    %8 = vector.broadcast %c240_i32 : i32 to vector<1x256xi32>
    %9 = arith.cmpi sge, %1, %8 : vector<1x256xi32>
    %c0_1 = arith.constant 0 : index
    %c0_2 = arith.constant 0 : index
    %10 = vector.load %arg2[%c0_1, %c0_2] : memref<8x256xf32, #tpu.memory_space<vmem>>, vector<8x256xf32>
    %c16_i32_3 = arith.constant 16 : i32
    %11 = tpu.dynamic_rotate %10 by %c16_i32_3 dim 1 : vector<8x256xf32>, i32 -> vector<8x256xf32>
    %c240_i32_4 = arith.constant 240 : i32
    %12 = tpu.dynamic_rotate %10 by %c240_i32_4 dim 1 : vector<8x256xf32>, i32 -> vector<8x256xf32>
    %cst = arith.constant 0x7F800000 : f32
    %13 = vector.shape_cast %7 : vector<1x256xi1> to vector<1x256xi1>
    %14 = vector.broadcast %13 : vector<1x256xi1> to vector<8x256xi1>
    %15 = vector.broadcast %cst : f32 to vector<8x256xf32>
    %16 = arith.select %14, %15, %11 : vector<8x256xi1>, vector<8x256xf32>
    %cst_5 = arith.constant 0x7F800000 : f32
    %17 = vector.shape_cast %9 : vector<1x256xi1> to vector<1x256xi1>
    %18 = vector.broadcast %17 : vector<1x256xi1> to vector<8x256xi1>
    %19 = vector.broadcast %cst_5 : f32 to vector<8x256xf32>
    %20 = arith.select %18, %19, %12 : vector<8x256xi1>, vector<8x256xf32>
    %21 = arith.minimumf %16, %20 : vector<8x256xf32>
    %22 = arith.minimumf %10, %21 : vector<8x256xf32>
    %cst_6 = arith.constant 0xFF800000 : f32
    %23 = vector.shape_cast %7 : vector<1x256xi1> to vector<1x256xi1>
    %24 = vector.broadcast %23 : vector<1x256xi1> to vector<8x256xi1>
    %25 = vector.broadcast %cst_6 : f32 to vector<8x256xf32>
    %26 = arith.select %24, %25, %11 : vector<8x256xi1>, vector<8x256xf32>
    %cst_7 = arith.constant 0xFF800000 : f32
    %27 = vector.shape_cast %9 : vector<1x256xi1> to vector<1x256xi1>
    %28 = vector.broadcast %27 : vector<1x256xi1> to vector<8x256xi1>
    %29 = vector.broadcast %cst_7 : f32 to vector<8x256xf32>
    %30 = arith.select %28, %29, %12 : vector<8x256xi1>, vector<8x256xf32>
    %31 = arith.maximumf %26, %30 : vector<8x256xf32>
    %32 = arith.maximumf %10, %31 : vector<8x256xf32>
    %c1_i32 = arith.constant 1 : i32
    %33 = tpu.dynamic_rotate %22 by %c1_i32 dim 1 : vector<8x256xf32>, i32 -> vector<8x256xf32>
    %c255_i32 = arith.constant 255 : i32
    %34 = tpu.dynamic_rotate %22 by %c255_i32 dim 1 : vector<8x256xf32>, i32 -> vector<8x256xf32>
    %cst_8 = arith.constant 0x7F800000 : f32
    %35 = vector.shape_cast %3 : vector<1x256xi1> to vector<1x256xi1>
    %36 = vector.broadcast %35 : vector<1x256xi1> to vector<8x256xi1>
    %37 = vector.broadcast %cst_8 : f32 to vector<8x256xf32>
    %38 = arith.select %36, %37, %33 : vector<8x256xi1>, vector<8x256xf32>
    %cst_9 = arith.constant 0x7F800000 : f32
    %39 = vector.shape_cast %5 : vector<1x256xi1> to vector<1x256xi1>
    %40 = vector.broadcast %39 : vector<1x256xi1> to vector<8x256xi1>
    %41 = vector.broadcast %cst_9 : f32 to vector<8x256xf32>
    %42 = arith.select %40, %41, %34 : vector<8x256xi1>, vector<8x256xf32>
    %43 = arith.minimumf %38, %42 : vector<8x256xf32>
    %44 = arith.minimumf %22, %43 : vector<8x256xf32>
    %c1_i32_10 = arith.constant 1 : i32
    %45 = tpu.dynamic_rotate %32 by %c1_i32_10 dim 1 : vector<8x256xf32>, i32 -> vector<8x256xf32>
    %c255_i32_11 = arith.constant 255 : i32
    %46 = tpu.dynamic_rotate %32 by %c255_i32_11 dim 1 : vector<8x256xf32>, i32 -> vector<8x256xf32>
    %cst_12 = arith.constant 0xFF800000 : f32
    %47 = vector.shape_cast %3 : vector<1x256xi1> to vector<1x256xi1>
    %48 = vector.broadcast %47 : vector<1x256xi1> to vector<8x256xi1>
    %49 = vector.broadcast %cst_12 : f32 to vector<8x256xf32>
    %50 = arith.select %48, %49, %45 : vector<8x256xi1>, vector<8x256xf32>
    %cst_13 = arith.constant 0xFF800000 : f32
    %51 = vector.shape_cast %5 : vector<1x256xi1> to vector<1x256xi1>
    %52 = vector.broadcast %51 : vector<1x256xi1> to vector<8x256xi1>
    %53 = vector.broadcast %cst_13 : f32 to vector<8x256xf32>
    %54 = arith.select %52, %53, %46 : vector<8x256xi1>, vector<8x256xf32>
    %55 = arith.maximumf %50, %54 : vector<8x256xf32>
    %56 = arith.maximumf %32, %55 : vector<8x256xf32>
    %c0_14 = arith.constant 0 : index
    %c0_15 = arith.constant 0 : index
    %57 = vector.load %arg3[%c0_14, %c0_15] : memref<8x256xf32, #tpu.memory_space<vmem>>, vector<8x256xf32>
    tpu.vector_store %arg3[%c0_14, %c0_15], %56 {strides = array<i32>} : memref<8x256xf32, #tpu.memory_space<vmem>>, vector<8x256xf32>,
    %c0_16 = arith.constant 0 : index
    %c0_17 = arith.constant 0 : index
    %58 = vector.load %arg4[%c0_16, %c0_17] : memref<8x256xf32, #tpu.memory_space<vmem>>, vector<8x256xf32>
    tpu.vector_store %arg4[%c0_16, %c0_17], %44 {strides = array<i32>} : memref<8x256xf32, #tpu.memory_space<vmem>>, vector<8x256xf32>,
    return
  }
  func.func @transform_0(%arg0: i32) -> (i32, i32) {
    %c0_i32 = arith.constant 0 : i32
    %c0_i32_0 = arith.constant 0 : i32
    %c0_i32_1 = arith.constant 0 : i32
    return %c0_i32, %c0_i32_0 : i32, i32
  }
  func.func @transform_1(%arg0: i32) -> (i32, i32) {
    %c0_i32 = arith.constant 0 : i32
    %c0_i32_0 = arith.constant 0 : i32
    return %arg0, %c0_i32 : i32, i32
  }
  func.func @transform_2(%arg0: i32) -> (i32, i32) {
    %c0_i32 = arith.constant 0 : i32
    %c0_i32_0 = arith.constant 0 : i32
    return %arg0, %c0_i32 : i32, i32
  }
  func.func @transform_3(%arg0: i32) -> (i32, i32) {
    %c0_i32 = arith.constant 0 : i32
    %c0_i32_0 = arith.constant 0 : i32
    return %arg0, %c0_i32 : i32, i32
  }
}

</mosaic_0001>

<bundles_post_ra>
// kernel: tpu_custom_call.1
= control target key start
LH: loop header
LB: loop body
LE: loop exit
PB: predicated region body
PF: predicated region fallthrough
CT: control target
= control target key end

     0   :  { %9 = vsyncpa [#allocation3], 0  ;;  %s401_s0 = inlined_call_operand.hbm [shape: s32[1,256], index: 0, kind: input, shape index: {}]   ;;  %s402_s1 = inlined_call_operand.hbm [shape: f32[8,256], index: 1, kind: input, shape index: {}]   ;;  %s403_s2 = inlined_call_operand.hbm [shape: f32[8,256], index: 2, kind: output, shape index: {0}]   ;;  %s404_s3 = inlined_call_operand.hbm [shape: f32[8,256], index: 3, kind: output, shape index: {1}]  }
   0x1   :  { %10 = vsyncpa [#allocation6], 0 }
   0x2   :  { %11 = vsyncpa [#allocation4], 0 }
   0x3   :  { %12 = vsyncpa [#allocation9], 0  ;;  %s18_s14 = sshll.u32 %s401_s0, 4  ;;  %s295_s15 = smov [#allocation2]   ;;  %s19_s14 = int_to_ptr.hbm [resolvable:$true] %s18_s14 }
   0x4   :  { %s20_s16 = sshll.u32 %s295_s15, 4  ;;  %s29_s19 = sshll.u32 %s402_s1, 4  ;;  %s21_s16 = int_to_ptr.vmem [resolvable:$true] %s20_s16  ;;  %s30_s19 = int_to_ptr.hbm [resolvable:$true] %s29_s19 }
   0x5   :  { %23 = dma.hbm_to_vmem [thread:$0]  %s19_s14, 32, %s21_s16, [#allocation3]  }
   0x6   :  { %s296_s20 = smov [#allocation5]  }
   0x7   :  { %s31_s21 = sshll.u32 %s296_s20, 4  ;;  %s32_s21 = int_to_ptr.vmem [resolvable:$true] %s31_s21 }
   0x8   :  { %34 = dma.hbm_to_vmem [thread:$0]  %s30_s19, 256, %s32_s21, [#allocation6]  }
   0x9   :  { %287 = dma.done.wait [#allocation3], 32  }
   0xa   :  { %288 = vsyncadd [#allocation3], 4294967264 }
   0xb   :  { %289 = dma.done.wait [#allocation6], 256  }
   0xc   :  { %290 = vsyncadd [#allocation6], 4294967040  ;;  %v53_v0 = vld [vmem:[#allocation5] sm:$0xff]  ;;  %s297_s0 = smov 112   ;;  %s298_s22 = smov 16   ;;  %v54_v1 = vld [vmem:[#allocation5 + $0x8] sm:$0xff]  ;;  %v44_v2 = vlaneseq }
   0xd   :  { %61 = vrot.lane.b32.xlu1 %v53_v0, %s297_s0  ;;  %55 = vrot.lane.b32.xlu0 %v53_v0, %s298_s22  ;;  %s299_s1 = smov 127   ;;  %s300_s23 = smov 1   ;;  %v43_v26 = vld [vmem:[#allocation2] sm:$0x3]  ;;  %v301_v28 = vmov 0  }
   0xe   :  { %v330_v3 = vand.u32 127, %v44_v2  ;;  %vm47_vm3 = vcmp.eq.s32.totalorder %v43_v26, 0  ;;  %vm48_vm4 = vcmp.eq.s32.totalorder %v43_v26, 15  ;;  %s302_s24 = smov [#allocation8]   ;;  %s166_s28 = sshll.u32 %s404_s3, 4  ;;  %s167_s28 = int_to_ptr.hbm [resolvable:$true] %s166_s28 }
   0xf   :  { %v106_v29 = vsel %vm47_vm3, 1, %v301_v28  ;;  %v113_v30 = vsel %vm48_vm4, 1, %v301_v28  ;;  %s164_s25 = sshll.u32 %s302_s24, 4  ;;  %s303_s3 = smov [#allocation7]   ;;  %s165_s25 = int_to_ptr.vmem [resolvable:$true] %s164_s25 }
  0x10   :  { %v46_v6 = vadd.s32 128, %v330_v3  ;;  %vm65_vm0 = vcmp.lt.s32.totalorder %v330_v3, 112  ;;  %vm49_vm1 = vcmp.lt.s32.totalorder %v330_v3, 16  ;;  %v107_v31 = vperm.slane %v106_v29, 0  ;;  %s153_s29 = sshll.u32 %s303_s3, 4  ;;  %s155_s5 = sshll.u32 %s403_s2, 4  ;;  %s154_s29 = int_to_ptr.vmem [resolvable:$true] %s153_s29  ;;  %s156_s5 = int_to_ptr.hbm [resolvable:$true] %s155_s5 }
  0x11   :  { %v108_v32 = vperm.slane %v106_v29, 1  ;;  %v114_v33 = vperm.slane %v113_v30, 0  ;;  %v115_v34 = vperm.slane %v113_v30, 1  ;;  %vm96_vm5 = vcmp.lt.s32.totalorder %v330_v3, 1 }
  0x12   :  { %vm52_vm2 = vcmp.ge.s32.totalorder %v46_v6, 240  ;;  %vm344_vm6 = vcmp.eq.s32.totalorder %v107_v31, 1  ;;  %vm103_vm8 = vcmp.lt.s32.totalorder %v330_v3, 127 }
  0x13   :  { %vm348_vm7 = vcmp.eq.s32.totalorder %v108_v32, 1  ;;  %vm357_vm9 = vcmp.eq.s32.totalorder %v114_v33, 1  ;;  %vm361_vm10 = vcmp.eq.s32.totalorder %v115_v34, 1 }
  0x15   :  { %63 = vrot.lane.b32.xlu1 %v54_v1, %s297_s0  ;;  %57 = vrot.lane.b32.xlu0 %v54_v1, %s298_s22 }
  0x7f   :  { %v62_v4 = vpop.permute.xlu1 %61  ;;  %v56_v5 = vpop.permute.xlu0 %55 }
  0x87   :  { %v64_v7 = vpop.permute.xlu1 %63  ;;  %v58_v8 = vpop.permute.xlu0 %57 }
  0x88   :  { %v66_v9 = vsel %vm65_vm0, %v62_v4, %v64_v7  ;;  %v67_v10 = vsel %vm65_vm0, %v64_v7, %v62_v4  ;;  %v59_v11 = vsel %vm49_vm1, %v56_v5, %v58_v8  ;;  %v60_v12 = vsel %vm49_vm1, %v58_v8, %v56_v5 }
  0x89   :  { %v79_v13 = vsel %vm52_vm2, inf, %v67_v10  ;;  %v72_v14 = vsel %vm49_vm1, inf, %v60_v12  ;;  %v87_v19 = vsel %vm52_vm2, -inf, %v67_v10  ;;  %v84_v20 = vsel %vm49_vm1, -inf, %v60_v12 }
  0x8a   :  { %v80_v15 = vmin.f32 %v72_v14, %v66_v9  ;;  %v81_v16 = vmin.f32 %v59_v11, %v79_v13  ;;  %v89_v21 = vmax.f32 %v59_v11, %v87_v19  ;;  %v88_v22 = vmax.f32 %v84_v20, %v66_v9 }
  0x8c   :  { %v82_v17 = vmin.f32 %v53_v0, %v80_v15  ;;  %v83_v18 = vmin.f32 %v54_v1, %v81_v16  ;;  %v335_v23 = vmax.f32 %v54_v1, %v89_v21  ;;  %v337_v24 = vmax.f32 %v53_v0, %v88_v22 }
  0x8e   :  { %99 = vrot.lane.b32.xlu0 %v82_v17, %s299_s1  ;;  %92 = vrot.lane.b32.xlu2 %v82_v17, %s300_s23 }
  0x8f   :  { %101 = vrot.lane.b32.xlu1 %v83_v18, %s299_s1 }
  0x96   :  { %126 = vrot.lane.b32.xlu0 %v335_v23, %s300_s23  ;;  %94 = vrot.lane.b32.xlu2 %v83_v18, %s300_s23 }
  0x97   :  { %130 = vrot.lane.b32.xlu1 %v337_v24, %s299_s1 }
  0x9e   :  { %124 = vrot.lane.b32.xlu2 %v337_v24, %s300_s23 }
  0xa6   :  { %132 = vrot.lane.b32.xlu2 %v335_v23, %s299_s1 }
  0xe8   :  { %v93_v25 = vpop.permute.xlu2 %92 }
  0xf0   :  { %v95_v27 = vpop.permute.xlu2 %94 }
  0xf1   :  { %v97_v38 = vsel %vm96_vm5, %v93_v25, %v95_v27  ;;  %v98_v39 = vsel %vm96_vm5, %v95_v27, %v93_v25 }
  0xf2   :  { %v111_v46 = vsel %vm344_vm6, inf, %v98_v39  ;;  %v112_v47 = vsel %vm348_vm7, inf, %v97_v38 }
  0xf8   :  { %v125_v37 = vpop.permute.xlu2 %124 }
 0x100   :  { %v100_v40 = vpop.permute.xlu0 %99  ;;  %v133_v55 = vpop.permute.xlu2 %132 }
 0x101   :  { %v102_v43 = vpop.permute.xlu1 %101 }
 0x102   :  { %v104_v44 = vsel %vm103_vm8, %v100_v40, %v102_v43  ;;  %v105_v45 = vsel %vm103_vm8, %v102_v43, %v100_v40 }
 0x103   :  { %v118_v48 = vsel %vm357_vm9, inf, %v104_v44  ;;  %v119_v49 = vsel %vm361_vm10, inf, %v105_v45 }
 0x104   :  { %v120_v50 = vmin.f32 %v111_v46, %v118_v48  ;;  %v121_v51 = vmin.f32 %v112_v47, %v119_v49 }
 0x106   :  { %v122_v52 = vmin.f32 %v82_v17, %v120_v50  ;;  %v123_v53 = vmin.f32 %v83_v18, %v121_v51 }
 0x108   :  { %146 = vst [vmem:[#allocation8] sm:$0xff] %v122_v52  ;;  %v127_v54 = vpop.permute.xlu0 %126 }
 0x109   :  { %147 = vst [vmem:[#allocation8 + $0x8] sm:$0xff] %v123_v53  ;;  %v128_v56 = vsel %vm96_vm5, %v125_v37, %v127_v54  ;;  %v129_v57 = vsel %vm96_vm5, %v127_v54, %v125_v37  ;;  %v131_v58 = vpop.permute.xlu1 %130 }
 0x10a   :  { %v136_v59 = vsel %vm344_vm6, -inf, %v129_v57  ;;  %v137_v60 = vsel %vm348_vm7, -inf, %v128_v56  ;;  %v134_v61 = vsel %vm103_vm8, %v131_v58, %v133_v55  ;;  %v135_v62 = vsel %vm103_vm8, %v133_v55, %v131_v58  ;;  %169 = dma.vmem_to_hbm [thread:$0]  %s165_s25, 256, %s167_s28, [#allocation9]  }
 0x10b   :  { %v138_v63 = vsel %vm357_vm9, -inf, %v134_v61  ;;  %v139_v0 = vsel %vm361_vm10, -inf, %v135_v62 }
 0x10c   :  { %v140_v1 = vmax.f32 %v136_v59, %v138_v63  ;;  %v141_v2 = vmax.f32 %v137_v60, %v139_v0 }
 0x10e   :  { %v142_v4 = vmax.f32 %v337_v24, %v140_v1  ;;  %v143_v3 = vmax.f32 %v335_v23, %v141_v2 }
 0x110   :  { %144 = vst [vmem:[#allocation7] sm:$0xff] %v142_v4 }
 0x111   :  { %145 = vst [vmem:[#allocation7 + $0x8] sm:$0xff] %v143_v3 }
 0x112   :  { %158 = dma.vmem_to_hbm [thread:$0]  %s154_s29, 256, %s156_s5, [#allocation4]  }
 0x113   :  { %291 = dma.done.wait [#allocation4], 256  }
 0x114   :  { %292 = vsyncadd [#allocation4], 4294967040 }
 0x115   :  { %293 = dma.done.wait [#allocation9], 256  }
 0x116   :  { %294 = vsyncadd [#allocation9], 4294967040 }
 0x117   :  { %178 = vsyncpa [#allocation3], 1 }
 0x118   :  { %179 = vsyncpa [#allocation6], 1 }
 0x119   :  { %180 = vsyncpa [#allocation4], 1 }
 0x11a   :  { %181 = vsyncpa [#allocation9], 1 }

</bundles_post_ra>
